<compile_context>
chip_gen: v5e
topology: v5e:2x2
jax: 0.10.0
libtpu: 0.0.40
codegen_flags: <defaults>
</compile_context>

<pallas_src>
import jax
import jax.numpy as jnp
from jax.experimental import pallas as pl
from jax.experimental.pallas import tpu as pltpu

HIDDEN = 256          # hidden_size of the QNetwork


def _round_up(n, m):
    return ((n + m - 1) // m) * m


def _cdiv(a, b):
    return -(-a // b)


def qnet_kernel(x_ref, w1_ref, w23_ref, b_ref, o_ref):
    """One batch tile: chained MXU matmuls + VPU relu epilogue.

    x_ref   : [TB, S]                   f32/bf16 (batch tile, moves with grid)
    w1_ref  : [S, 256]                  bf16     (resident)
    w23_ref : [256, 256 + OUT_DIM]      bf16     (W2 || W3_pad, resident)
    b_ref   : [1, 256 + 256 + OUT_DIM]  f32      (b1 | b2 | b3_pad, resident)
    o_ref   : [TB, OUT_DIM]             f32      (narrow output tile)
    """
    out_dim = o_ref.shape[-1]
    b1 = b_ref[:, 0:HIDDEN]                               # f32 [1, 256]
    b2 = b_ref[:, HIDDEN:2 * HIDDEN]                      # f32 [1, 256]
    b3 = b_ref[:, 2 * HIDDEN:2 * HIDDEN + out_dim]        # f32 [1, OUT_DIM]

    # fc1 + relu  (bf16 operands, f32 accumulate; bias/relu in f32)
    x_bf = x_ref[...].astype(jnp.bfloat16)                # no-op if already bf16
    h1 = jnp.dot(x_bf, w1_ref[...],
                 preferred_element_type=jnp.float32) + b1
    h1 = jnp.maximum(h1, 0.0)
    h1_bf = h1.astype(jnp.bfloat16)

    # One wide MXU pass over h1 against the packed [W2 || W3_pad] slab:
    #   tmp[:, :256]  = h1 @ W2      (fc2 pre-activation)
    #   tmp[:, 256:]  = h1 @ W3_pad  (partial of the output layer)
    tmp = jnp.dot(h1_bf, w23_ref[...], preferred_element_type=jnp.float32)
    h2 = jnp.maximum(tmp[:, :HIDDEN] + b2, 0.0)

    # out = h1 @ W3 + h2 @ W3 + b3  ==  (h1 + h2) @ W3 + b3
    # TODO(synk): on v6e/v7x a bf16 relu/residual epilogue would shave a few
    # VPU passes; kept f32 here so one kernel stays numerically safe on v5e.
    w3 = w23_ref[:, HIDDEN:HIDDEN + out_dim]              # bf16 [256, OUT_DIM]
    o_ref[...] = (tmp[:, HIDDEN:HIDDEN + out_dim]
                  + jnp.dot(h2.astype(jnp.bfloat16), w3,
                            preferred_element_type=jnp.float32)
                  + b3)


def _choose_tb(batch, tb_max=2048):
    """Batch tile: multiple of 8, capped at tb_max, and for non-tiny batches
    capped at round_up(cdiv(batch, 2), 128) so the grid has >= 2 steps and
    both v7x TensorCores get work."""
    tb = min(tb_max, _round_up(max(batch, 1), 8))
    if batch > 256:
        half = max(128, _round_up(_cdiv(batch, 2), 128))
        tb = min(tb, half)
    return max(tb, 8)


def qnetwork_forward(x, packed_params, action_size, *, tb_max=2048):
    """Run the QNetwork forward pass. Returns [batch, action_size] f32."""
    w1p, w23, bias = packed_params
    batch, state = x.shape
    out_dim = w23.shape[1] - HIDDEN
    assert state == w1p.shape[0], "x feature dim must match packed W1"
    assert action_size <= out_dim

    tb = _choose_tb(batch, tb_max)
    grid = (_cdiv(batch, tb),)     # partial edge block handled by Pallas

    out = pl.pallas_call(
        qnet_kernel,
        out_shape=jax.ShapeDtypeStruct((batch, out_dim), jnp.float32),
        grid_spec=pltpu.PrefetchScalarGridSpec(
            num_scalar_prefetch=0,
            grid=grid,
            in_specs=[
                # batch tile of x: moves with the grid (double-buffered)
                pl.BlockSpec((tb, state), lambda i: (i, 0)),
                # weights / biases: constant block index -> stay resident
                pl.BlockSpec((w1p.shape[0], HIDDEN), lambda i: (0, 0)),
                pl.BlockSpec((HIDDEN, HIDDEN + out_dim), lambda i: (0, 0)),
                pl.BlockSpec((1, 2 * HIDDEN + out_dim), lambda i: (0, 0)),
            ],
            out_specs=pl.BlockSpec((tb, out_dim), lambda i: (i, 0)),
        ),
        compiler_params=pltpu.CompilerParams(
            dimension_semantics=("parallel",),   # megacore sharding on v7x
        ),
    )(x, w1p, w23, bias)

    # Drop the (at most 7) padded action columns; no batch padding to drop.
    if out_dim != action_size:
        out = out[:, :action_size]
    return out


def init_params(key, state_size, action_size):
    """Deterministic init mimicking PyTorch's default Linear init:
    U(-1/sqrt(fan_in), 1/sqrt(fan_in)). Weights stored as [in, out] (i.e. W^T)."""
    def linear(key, fan_in, fan_out):
        kw, kb = jax.random.split(key)
        bound = 1.0 / jnp.sqrt(fan_in)
        w = jax.random.uniform(kw, (fan_in, fan_out), jnp.float32, -bound, bound)
        b = jax.random.uniform(kb, (1, fan_out), jnp.float32, -bound, bound)
        return w, b

    k1, k2, k3 = jax.random.split(key, 3)
    w1, b1 = linear(k1, state_size, HIDDEN)
    w2, b2 = linear(k2, HIDDEN, HIDDEN)
    w3, b3 = linear(k3, HIDDEN, action_size)
    return w1, b1, w2, b2, w3, b3


def pack_params(params, action_size, dtype=jnp.bfloat16):
    """One-time, outside the per-step call:
       - zero-pad W3/b3 to round_up(action_size, 8) output columns
       - concat W2 || W3_pad into one [256, 256+OUT_DIM] weight slab
         (enables the single wide h1 pass on the MXU)
       - concat b1 | b2 | b3_pad into one f32 bias row
       - cast weights to bf16 (half the weight DMA bytes, 2x MXU rate)."""
    w1, b1, w2, b2, w3, b3 = params
    out_dim = _round_up(action_size, 8)
    w3p = jnp.zeros((HIDDEN, out_dim), jnp.float32).at[:, :action_size].set(w3)
    b3p = jnp.zeros((1, out_dim), jnp.float32).at[:, :action_size].set(b3)
    w1p = w1.astype(dtype)
    w23 = jnp.concatenate([w2, w3p], axis=1).astype(dtype)
    bias = jnp.concatenate([b1, b2, b3p], axis=1).astype(jnp.float32)
    return w1p, w23, bias


def reference_forward(x, params):
    """Pure-f32 reference (original module semantics)."""
    w1, b1, w2, b2, w3, b3 = params
    h1 = jax.nn.relu(x @ w1 + b1)
    h2 = jax.nn.relu(h1 @ w2 + b2)
    return (h1 + h2) @ w3 + b3


def reference_forward_bf16(x, params):
    """Reference mirroring the kernel's bf16-operand / f32-accumulate dots and
    its  h1@W3 + h2@W3  decomposition of the residual output layer."""
    w1, b1, w2, b2, w3, b3 = params
    bf = jnp.bfloat16

    def d(a, b):
        return jnp.dot(a.astype(bf), b.astype(bf),
                       preferred_element_type=jnp.float32)

    h1 = jax.nn.relu(d(x, w1) + b1)
    h2 = jax.nn.relu(d(h1, w2) + b2)
    return d(h1, w3) + d(h2, w3) + b3


if __name__ == "__main__":
    state_size = 32
    action_size = 4
    batch = 2

    key = jax.random.PRNGKey(0)
    kx, kp = jax.random.split(key)
    x = jax.random.normal(kx, (batch, state_size), dtype=jnp.float32)
    params = init_params(kp, state_size, action_size)
    packed = pack_params(params, action_size)

    # Small (inference-sized) batch.
    out = qnetwork_forward(x, packed, action_size)
    out = jax.block_until_ready(out)
    assert out.shape == (batch, action_size)
    assert jnp.allclose(out, reference_forward_bf16(x, params),
                        atol=1e-3, rtol=1e-3), "mismatch vs bf16 reference"
    assert jnp.allclose(out, reference_forward(x, params),
                        atol=2e-2, rtol=2e-2), "mismatch vs f32 reference"

    # Training-sized batch: exercises the multi-step grid (>= 2 steps for v7x)
    # and the partial edge-block path (1000 is not a multiple of the tile).
    xb = jax.random.normal(kx, (1000, state_size), dtype=jnp.float32)
    outb = jax.block_until_ready(qnetwork_forward(xb, packed, action_size))
    assert outb.shape == (1000, action_size)
    assert jnp.allclose(outb, reference_forward_bf16(xb, params),
                        atol=1e-3, rtol=1e-3), "mismatch vs bf16 reference (big batch)"

    print("KERNEL_OK")
</pallas_src>

<mosaic_0001>
module attributes {stable_mosaic.version = 11 : i64} {
  func.func @qnet_kernel(%arg0: i32, %arg1: memref<8x32xf32, #tpu.memory_space<vmem>>, %arg2: memref<32x256xbf16, #tpu.memory_space<vmem>>, %arg3: memref<256x264xbf16, #tpu.memory_space<vmem>>, %arg4: memref<1x520xf32, #tpu.memory_space<vmem>>, %arg5: memref<8x8xf32, #tpu.memory_space<vmem>>) attributes {dimension_semantics = [#tpu.dimension_semantics<parallel>], iteration_bounds = array<i64: 1>, scalar_prefetch = 0 : i64, scratch_operands = 0 : i64, tpu.core_type = #tpu.core_type<tc>, window_params = [{transform_indices = @transform_0, window_bounds = array<i64: 8, 32>}, {pipeline_mode = #tpu.pipeline_mode<synchronous>, transform_indices = @transform_1, window_bounds = array<i64: 32, 256>}, {pipeline_mode = #tpu.pipeline_mode<synchronous>, transform_indices = @transform_2, window_bounds = array<i64: 256, 264>}, {pipeline_mode = #tpu.pipeline_mode<synchronous>, transform_indices = @transform_3, window_bounds = array<i64: 1, 520>}, {transform_indices = @transform_4, window_bounds = array<i64: 8, 8>}]} {
    %c0 = arith.constant 0 : index
    %c0_0 = arith.constant 0 : index
    %0 = vector.load %arg4[%c0, %c0_0] : memref<1x520xf32, #tpu.memory_space<vmem>>, vector<1x256xf32>
    %c0_1 = arith.constant 0 : index
    %c256 = arith.constant 256 : index
    %1 = vector.load %arg4[%c0_1, %c256] : memref<1x520xf32, #tpu.memory_space<vmem>>, vector<1x256xf32>
    %c0_2 = arith.constant 0 : index
    %c512 = arith.constant 512 : index
    %2 = vector.load %arg4[%c0_2, %c512] : memref<1x520xf32, #tpu.memory_space<vmem>>, vector<1x8xf32>
    %c0_3 = arith.constant 0 : index
    %c0_4 = arith.constant 0 : index
    %3 = vector.load %arg1[%c0_3, %c0_4] : memref<8x32xf32, #tpu.memory_space<vmem>>, vector<8x32xf32>
    %4 = arith.truncf %3 : vector<8x32xf32> to vector<8x32xbf16>
    %c0_5 = arith.constant 0 : index
    %c0_6 = arith.constant 0 : index
    %5 = vector.load %arg2[%c0_5, %c0_6] : memref<32x256xbf16, #tpu.memory_space<vmem>>, vector<32x256xbf16>
    %cst = arith.constant dense<0.000000e+00> : vector<8x256xf32>
    %6 = tpu.matmul %4, %5, %cst {dimension_numbers = #tpu.dot_dimension_numbers<[1], [0], [0], [1], [0, 0, 1, 1], [], []>} : vector<8x32xbf16>, vector<32x256xbf16>, vector<8x256xf32> -> vector<8x256xf32>
    %7 = vector.broadcast %0 : vector<1x256xf32> to vector<8x256xf32>
    %8 = arith.addf %6, %7 : vector<8x256xf32>
    %cst_7 = arith.constant 0.000000e+00 : f32
    %9 = vector.broadcast %cst_7 : f32 to vector<8x256xf32>
    %10 = arith.maximumf %8, %9 : vector<8x256xf32>
    %11 = arith.truncf %10 : vector<8x256xf32> to vector<8x256xbf16>
    %c0_8 = arith.constant 0 : index
    %c0_9 = arith.constant 0 : index
    %12 = vector.load %arg3[%c0_8, %c0_9] : memref<256x264xbf16, #tpu.memory_space<vmem>>, vector<256x264xbf16>
    %cst_10 = arith.constant dense<0.000000e+00> : vector<8x264xf32>
    %13 = tpu.matmul %11, %12, %cst_10 {dimension_numbers = #tpu.dot_dimension_numbers<[1], [0], [0], [1], [0, 0, 1, 1], [], []>} : vector<8x256xbf16>, vector<256x264xbf16>, vector<8x264xf32> -> vector<8x264xf32>
    %14 = vector.extract_strided_slice %13 {offsets = [0, 0], sizes = [8, 256], strides = [1, 1]} : vector<8x264xf32> to vector<8x256xf32>
    %15 = vector.broadcast %1 : vector<1x256xf32> to vector<8x256xf32>
    %16 = arith.addf %14, %15 : vector<8x256xf32>
    %cst_11 = arith.constant 0.000000e+00 : f32
    %17 = vector.broadcast %cst_11 : f32 to vector<8x256xf32>
    %18 = arith.maximumf %16, %17 : vector<8x256xf32>
    %c0_12 = arith.constant 0 : index
    %c256_13 = arith.constant 256 : index
    %19 = vector.load %arg3[%c0_12, %c256_13] : memref<256x264xbf16, #tpu.memory_space<vmem>>, vector<256x8xbf16>
    %20 = vector.extract_strided_slice %13 {offsets = [0, 256], sizes = [8, 8], strides = [1, 1]} : vector<8x264xf32> to vector<8x8xf32>
    %21 = arith.truncf %18 : vector<8x256xf32> to vector<8x256xbf16>
    %cst_14 = arith.constant dense<0.000000e+00> : vector<8x8xf32>
    %22 = tpu.matmul %21, %19, %cst_14 {dimension_numbers = #tpu.dot_dimension_numbers<[1], [0], [0], [1], [0, 0, 1, 1], [], []>} : vector<8x256xbf16>, vector<256x8xbf16>, vector<8x8xf32> -> vector<8x8xf32>
    %23 = arith.addf %20, %22 : vector<8x8xf32>
    %24 = vector.broadcast %2 : vector<1x8xf32> to vector<8x8xf32>
    %25 = arith.addf %23, %24 : vector<8x8xf32>
    %c0_15 = arith.constant 0 : index
    %c0_16 = arith.constant 0 : index
    %26 = vector.load %arg5[%c0_15, %c0_16] : memref<8x8xf32, #tpu.memory_space<vmem>>, vector<8x8xf32>
    tpu.vector_store %arg5[%c0_15, %c0_16], %25 {strides = array<i32>} : memref<8x8xf32, #tpu.memory_space<vmem>>, vector<8x8xf32>,
    return
  }
  func.func @transform_0(%arg0: i32) -> (i32, i32) {
    %c0_i32 = arith.constant 0 : i32
    %c0_i32_0 = arith.constant 0 : i32
    return %arg0, %c0_i32 : i32, i32
  }
  func.func @transform_1(%arg0: i32) -> (i32, i32) {
    %c0_i32 = arith.constant 0 : i32
    %c0_i32_0 = arith.constant 0 : i32
    %c0_i32_1 = arith.constant 0 : i32
    return %c0_i32, %c0_i32_0 : i32, i32
  }
  func.func @transform_2(%arg0: i32) -> (i32, i32) {
    %c0_i32 = arith.constant 0 : i32
    %c0_i32_0 = arith.constant 0 : i32
    %c0_i32_1 = arith.constant 0 : i32
    return %c0_i32, %c0_i32_0 : i32, i32
  }
  func.func @transform_3(%arg0: i32) -> (i32, i32) {
    %c0_i32 = arith.constant 0 : i32
    %c0_i32_0 = arith.constant 0 : i32
    %c0_i32_1 = arith.constant 0 : i32
    return %c0_i32, %c0_i32_0 : i32, i32
  }
  func.func @transform_4(%arg0: i32) -> (i32, i32) {
    %c0_i32 = arith.constant 0 : i32
    %c0_i32_0 = arith.constant 0 : i32
    return %arg0, %c0_i32 : i32, i32
  }
}

</mosaic_0001>

<bundles_post_ra>
// kernel: tpu_custom_call.1
= control target key start
LH: loop header
LB: loop body
LE: loop exit
PB: predicated region body
PF: predicated region fallthrough
CT: control target
= control target key end

     0   :  { %9 = vsyncpa [#allocation3], 0  ;;  %vm53_vm0 = vcmask 261120   ;;  %vm527_vm1 = vcmask 64512   ;;  %s1196_s0 = inlined_call_operand.vmem [shape: f32[2,32], index: 0, kind: input, shape index: {}]   ;;  %s1197_s1 = inlined_call_operand.vmem [shape: bf16[32,256], index: 1, kind: input, shape index: {}]   ;;  %s1198_s2 = inlined_call_operand.vmem [shape: bf16[256,264], index: 2, kind: input, shape index: {}]   ;;  %s1199_s3 = inlined_call_operand.vmem [shape: f32[1,520], index: 3, kind: input, shape index: {}]   ;;  %s1200_s4 = inlined_call_operand.hbm [shape: f32[2,8], index: 4, kind: output, shape index: {}]  }
   0x1   :  { %v557_v0 = vld [vmem:[%s1197_s1 + $0x10] sm:$0xf]  ;;  %v760_v1 = vld [vmem:[%s1197_s1 + $0x14] sm:$0xf0]  ;;  %v759_v3 = vld [vmem:[%s1197_s1 + $0x14] sm:$0xf] }
   0x2   :  { %v558_v2 = vor.u32 %v760_v1, %v557_v0  ;;  %v559_v4 = vld [vmem:[%s1197_s1 + $0x18] sm:$0xf0]  ;;  %v549_v5 = vld [vmem:[%s1197_s1] sm:$0xf]  ;;  %v758_v7 = vld [vmem:[%s1197_s1 + $0x4] sm:$0xf0] }
   0x3   :  { %v562_v6 = vor.u32 %v759_v3, %v559_v4  ;;  %v757_v8 = vld [vmem:[%s1197_s1 + $0x4] sm:$0xf]  ;;  %v551_v9 = vld [vmem:[%s1197_s1 + $0x8] sm:$0xf0]  ;;  %v550_v10 = vor.u32 %v758_v7, %v549_v5  ;;  %v651_v12 = vld [vmem:[%s1198_s2 + $0xa8] sm:$0xf] }
   0x4   :  { %63 = vmatpush.bf16.msra.mxu0 %v558_v2  ;;  %v22_v11 = vld [vmem:[%s1196_s0] sm:$0xff]  ;;  %v783_v13 = vld [vmem:[%s1198_s2 + $0xb0] sm:$0xf0]  ;;  %v554_v14 = vor.u32 %v757_v8, %v551_v9  ;;  %v747_v16 = vld [vmem:[%s1198_s2 + $0x168] sm:$0xf] }
   0x5   :  { %76 = vmatpush.bf16.msra.mxu1 %v562_v6  ;;  %v652_v15 = vor.u32 %v783_v13, %v651_v12  ;;  %v807_v17 = vld [vmem:[%s1198_s2 + $0x170] sm:$0xf0]  ;;  %v639_v18 = vld [vmem:[%s1198_s2 + $0x90] sm:$0xf]  ;;  %v780_v20 = vld [vmem:[%s1198_s2 + $0x98] sm:$0xf0]  ;;  %v23_v23 = vpack.c.bf16 %v22_v11, %v22_v11 }
   0x6   :  { %v748_v19 = vor.u32 %v807_v17, %v747_v16  ;;  %v735_v21 = vld [vmem:[%s1198_s2 + $0x150] sm:$0xf]  ;;  %v804_v22 = vld [vmem:[%s1198_s2 + $0x158] sm:$0xf0]  ;;  %v640_v24 = vor.u32 %v780_v20, %v639_v18  ;;  %v627_v26 = vld [vmem:[%s1198_s2 + $0x78] sm:$0xf] }
   0x7   :  { %407 = vmatpush.bf16.msra.mxu2 %v652_v15  ;;  %v736_v25 = vor.u32 %v804_v22, %v735_v21  ;;  %v777_v27 = vld [vmem:[%s1198_s2 + $0x80] sm:$0xf0]  ;;  %v723_v28 = vld [vmem:[%s1198_s2 + $0x138] sm:$0xf]  ;;  %v782_v30 = vld [vmem:[%s1198_s2 + $0xac] sm:$0xf] }
   0x8   :  { %64 = vmatpush.bf16.msra.mxu0 %v550_v10  ;;  %420 = vmatpush.bf16.msra.mxu3 %v748_v19  ;;  %v801_v29 = vld [vmem:[%s1198_s2 + $0x140] sm:$0xf0]  ;;  %v653_v31 = vld [vmem:[%s1198_s2 + $0xb4] sm:$0xf0]  ;;  %v806_v32 = vld [vmem:[%s1198_s2 + $0x16c] sm:$0xf]  ;;  %v628_v34 = vor.u32 %v777_v27, %v627_v26 }
   0x9   :  { %77 = vmatpush.bf16.msra.mxu1 %v554_v14  ;;  %v749_v33 = vld [vmem:[%s1198_s2 + $0x174] sm:$0xf0]  ;;  %v615_v35 = vld [vmem:[%s1198_s2 + $0x60] sm:$0xf]  ;;  %v774_v36 = vld [vmem:[%s1198_s2 + $0x68] sm:$0xf0]  ;;  %v656_v37 = vor.u32 %v782_v30, %v653_v31  ;;  %v724_v39 = vor.u32 %v801_v29, %v723_v28 }
   0xa   :  { %v752_v38 = vor.u32 %v806_v32, %v749_v33  ;;  %v711_v40 = vld [vmem:[%s1198_s2 + $0x120] sm:$0xf]  ;;  %v779_v41 = vld [vmem:[%s1198_s2 + $0x94] sm:$0xf]  ;;  %v798_v43 = vld [vmem:[%s1198_s2 + $0x128] sm:$0xf0]  ;;  %v616_v48 = vor.u32 %v774_v36, %v615_v35 }
   0xb   :  { %563 = vmatmul.msk.bf16.vlgmr.msra.gmra.mxu0 %vm53_vm0, %v23_v23  ;;  %408 = vmatpush.bf16.msra.mxu2 %v640_v24  ;;  %v641_v42 = vld [vmem:[%s1198_s2 + $0x9c] sm:$0xf0]  ;;  %v803_v45 = vld [vmem:[%s1198_s2 + $0x154] sm:$0xf]  ;;  %v776_v49 = vld [vmem:[%s1198_s2 + $0x7c] sm:$0xf]  ;;  %v712_v52 = vor.u32 %v798_v43, %v711_v40 }
   0xc   :  { %564 = vmatmul.msk.bf16.vlgmr.msra.gmra.mxu1 %vm53_vm0, %v23_v23  ;;  %421 = vmatpush.bf16.msra.mxu3 %v736_v25  ;;  %v644_v44 = vor.u32 %v779_v41, %v641_v42  ;;  %v737_v46 = vld [vmem:[%s1198_s2 + $0x15c] sm:$0xf0]  ;;  %v629_v50 = vld [vmem:[%s1198_s2 + $0x84] sm:$0xf0]  ;;  %v800_v51 = vld [vmem:[%s1198_s2 + $0x13c] sm:$0xf] }
   0xd   :  { %433 = vmatpush.bf16.msrb.mxu0 %v656_v37  ;;  %446 = vmatpush.bf16.msrb.mxu1 %v752_v38  ;;  %v740_v47 = vor.u32 %v803_v45, %v737_v46  ;;  %v603_v53 = vld [vmem:[%s1198_s2 + $0x48] sm:$0xf]  ;;  %v771_v54 = vld [vmem:[%s1198_s2 + $0x50] sm:$0xf0]  ;;  %v632_v58 = vor.u32 %v776_v49, %v629_v50  ;;  %v773_v60 = vld [vmem:[%s1198_s2 + $0x64] sm:$0xf] }
   0xe   :  { %v725_v55 = vld [vmem:[%s1198_s2 + $0x144] sm:$0xf0]  ;;  %v795_v57 = vld [vmem:[%s1198_s2 + $0x110] sm:$0xf0]  ;;  %v617_v61 = vld [vmem:[%s1198_s2 + $0x6c] sm:$0xf0]  ;;  %v604_v0 = vor.u32 %v771_v54, %v603_v53 }
   0xf   :  { %409 = vmatpush.bf16.msra.mxu2 %v628_v34  ;;  %v699_v56 = vld [vmem:[%s1198_s2 + $0x108] sm:$0xf]  ;;  %v728_v59 = vor.u32 %v800_v51, %v725_v55  ;;  %v797_v62 = vld [vmem:[%s1198_s2 + $0x124] sm:$0xf]  ;;  %v713_v63 = vld [vmem:[%s1198_s2 + $0x12c] sm:$0xf0]  ;;  %v620_v6 = vor.u32 %v773_v60, %v617_v61 }
  0x10   :  { %422 = vmatpush.bf16.msra.mxu3 %v724_v39  ;;  %v700_v1 = vor.u32 %v795_v57, %v699_v56  ;;  %v591_v2 = vld [vmem:[%s1198_s2 + $0x30] sm:$0xf]  ;;  %v768_v3 = vld [vmem:[%s1198_s2 + $0x38] sm:$0xf0]  ;;  %v716_v7 = vor.u32 %v797_v62, %v713_v63  ;;  %v770_v8 = vld [vmem:[%s1198_s2 + $0x4c] sm:$0xf] }
  0x11   :  { %434 = vmatpush.bf16.msrb.mxu0 %v644_v44  ;;  %447 = vmatpush.bf16.msrb.mxu1 %v740_v47  ;;  %v687_v4 = vld [vmem:[%s1198_s2 + $0xf0] sm:$0xf]  ;;  %v792_v5 = vld [vmem:[%s1198_s2 + $0xf8] sm:$0xf0]  ;;  %v605_v9 = vld [vmem:[%s1198_s2 + $0x54] sm:$0xf0]  ;;  %v592_v12 = vor.u32 %v768_v3, %v591_v2 }
  0x12   :  { %v794_v10 = vld [vmem:[%s1198_s2 + $0x10c] sm:$0xf]  ;;  %v701_v11 = vld [vmem:[%s1198_s2 + $0x114] sm:$0xf0]  ;;  %v688_v13 = vor.u32 %v792_v5, %v687_v4  ;;  %v765_v15 = vld [vmem:[%s1198_s2 + $0x20] sm:$0xf0]  ;;  %v608_v18 = vor.u32 %v770_v8, %v605_v9 }
  0x13   :  { %410 = vmatpush.bf16.msra.mxu2 %v616_v48  ;;  %v579_v14 = vld [vmem:[%s1198_s2 + $0x18] sm:$0xf]  ;;  %v789_v17 = vld [vmem:[%s1198_s2 + $0xe0] sm:$0xf0]  ;;  %v704_v19 = vor.u32 %v794_v10, %v701_v11  ;;  %v767_v20 = vld [vmem:[%s1198_s2 + $0x34] sm:$0xf] }
  0x14   :  { %423 = vmatpush.bf16.msra.mxu3 %v712_v52  ;;  %v675_v16 = vld [vmem:[%s1198_s2 + $0xd8] sm:$0xf]  ;;  %v593_v21 = vld [vmem:[%s1198_s2 + $0x3c] sm:$0xf0]  ;;  %v791_v22 = vld [vmem:[%s1198_s2 + $0xf4] sm:$0xf]  ;;  %v580_v24 = vor.u32 %v765_v15, %v579_v14 }
  0x15   :  { %435 = vmatpush.bf16.msrb.mxu0 %v632_v58  ;;  %448 = vmatpush.bf16.msrb.mxu1 %v728_v59  ;;  %v689_v23 = vld [vmem:[%s1198_s2 + $0xfc] sm:$0xf0]  ;;  %v676_v25 = vor.u32 %v789_v17, %v675_v16  ;;  %v762_v27 = vld [vmem:[%s1198_s2 + $0x8] sm:$0xf0]  ;;  %v659_v30 = vld [vmem:[%s1198_s2 + $0xb0] sm:$0xf]  ;;  %v596_v32 = vor.u32 %v767_v20, %v593_v21 }
  0x16   :  { %v567_v26 = vld [vmem:[%s1198_s2] sm:$0xf]  ;;  %v786_v29 = vld [vmem:[%s1198_s2 + $0xc8] sm:$0xf0]  ;;  %v784_v31 = vld [vmem:[%s1198_s2 + $0xb8] sm:$0xf0]  ;;  %v692_v33 = vor.u32 %v791_v22, %v689_v23 }
  0x17   :  { %411 = vmatpush.bf16.msra.mxu2 %v604_v0  ;;  %v663_v28 = vld [vmem:[%s1198_s2 + $0xc0] sm:$0xf]  ;;  %v755_v34 = vld [vmem:[%s1198_s2 + $0x170] sm:$0xf]  ;;  %v808_v35 = vld [vmem:[%s1198_s2 + $0x178] sm:$0xf0]  ;;  %v568_v36 = vor.u32 %v762_v27, %v567_v26  ;;  %v660_v38 = vor.u32 %v784_v31, %v659_v30 }
  0x18   :  { %424 = vmatpush.bf16.msra.mxu3 %v700_v1  ;;  %v664_v37 = vor.u32 %v786_v29, %v663_v28  ;;  %v756_v39 = vor.u32 %v808_v35, %v755_v34  ;;  %v647_v40 = vld [vmem:[%s1198_s2 + $0x98] sm:$0xf]  ;;  %v781_v41 = vld [vmem:[%s1198_s2 + $0xa0] sm:$0xf0]  ;;  %v764_v46 = vld [vmem:[%s1198_s2 + $0x1c] sm:$0xf] }
  0x19   :  { %436 = vmatpush.bf16.msrb.mxu0 %v620_v6  ;;  %449 = vmatpush.bf16.msrb.mxu1 %v716_v7  ;;  %v743_v42 = vld [vmem:[%s1198_s2 + $0x158] sm:$0xf]  ;;  %v805_v43 = vld [vmem:[%s1198_s2 + $0x160] sm:$0xf0]  ;;  %v648_v44 = vor.u32 %v781_v41, %v647_v40  ;;  %v581_v47 = vld [vmem:[%s1198_s2 + $0x24] sm:$0xf0] }
  0x1a   :  { %v744_v45 = vor.u32 %v805_v43, %v743_v42  ;;  %v788_v48 = vld [vmem:[%s1198_s2 + $0xdc] sm:$0xf]  ;;  %v584_v49 = vor.u32 %v764_v46, %v581_v47  ;;  %v677_v50 = vld [vmem:[%s1198_s2 + $0xe4] sm:$0xf0]  ;;  %v635_v51 = vld [vmem:[%s1198_s2 + $0x80] sm:$0xf] }
  0x1b   :  { %412 = vmatpush.bf16.msra.mxu2 %v592_v12  ;;  %v778_v52 = vld [vmem:[%s1198_s2 + $0x88] sm:$0xf0]  ;;  %v680_v53 = vor.u32 %v788_v48, %v677_v50  ;;  %v731_v55 = vld [vmem:[%s1198_s2 + $0x140] sm:$0xf]  ;;  %v761_v58 = vld [vmem:[%s1198_s2 + $0x4] sm:$0xf] }
  0x1c   :  { %425 = vmatpush.bf16.msra.mxu3 %v688_v13  ;;  %v636_v54 = vor.u32 %v778_v52, %v635_v51  ;;  %v802_v56 = vld [vmem:[%s1198_s2 + $0x148] sm:$0xf0]  ;;  %v569_v59 = vld [vmem:[%s1198_s2 + $0xc] sm:$0xf0]  ;;  %v785_v60 = vld [vmem:[%s1198_s2 + $0xc4] sm:$0xf] }
  0x1d   :  { %437 = vmatpush.bf16.msrb.mxu0 %v608_v18  ;;  %450 = vmatpush.bf16.msrb.mxu1 %v704_v19  ;;  %v732_v57 = vor.u32 %v802_v56, %v731_v55  ;;  %v572_v61 = vor.u32 %v761_v58, %v569_v59  ;;  %v665_v62 = vld [vmem:[%s1198_s2 + $0xcc] sm:$0xf0]  ;;  %v623_v63 = vld [vmem:[%s1198_s2 + $0x68] sm:$0xf]  ;;  %v775_v0 = vld [vmem:[%s1198_s2 + $0x70] sm:$0xf0] }
  0x1e   :  { %v668_v1 = vor.u32 %v785_v60, %v665_v62  ;;  %v624_v2 = vor.u32 %v775_v0, %v623_v63  ;;  %v719_v3 = vld [vmem:[%s1198_s2 + $0x128] sm:$0xf]  ;;  %v799_v4 = vld [vmem:[%s1198_s2 + $0x130] sm:$0xf0]  ;;  %v611_v6 = vld [vmem:[%s1198_s2 + $0x50] sm:$0xf] }
  0x1f   :  { %413 = vmatpush.bf16.msra.mxu2 %v580_v24  ;;  %v720_v5 = vor.u32 %v799_v4, %v719_v3  ;;  %v772_v7 = vld [vmem:[%s1198_s2 + $0x58] sm:$0xf0]  ;;  %v707_v8 = vld [vmem:[%s1198_s2 + $0x110] sm:$0xf]  ;;  %v599_v12 = vld [vmem:[%s1198_s2 + $0x38] sm:$0xf] }
  0x20   :  { %426 = vmatpush.bf16.msra.mxu3 %v676_v25  ;;  %v612_v9 = vor.u32 %v772_v7, %v611_v6  ;;  %v796_v10 = vld [vmem:[%s1198_s2 + $0x118] sm:$0xf0]  ;;  %v769_v13 = vld [vmem:[%s1198_s2 + $0x40] sm:$0xf0]  ;;  %v695_v14 = vld [vmem:[%s1198_s2 + $0xf8] sm:$0xf] }
  0x21   :  { %438 = vmatpush.bf16.msrb.mxu0 %v596_v32  ;;  %451 = vmatpush.bf16.msrb.mxu1 %v692_v33  ;;  %v708_v11 = vor.u32 %v796_v10, %v707_v8  ;;  %v600_v15 = vor.u32 %v769_v13, %v599_v12  ;;  %v793_v16 = vld [vmem:[%s1198_s2 + $0x100] sm:$0xf0]  ;;  %v587_v18 = vld [vmem:[%s1198_s2 + $0x20] sm:$0xf]  ;;  %v766_v19 = vld [vmem:[%s1198_s2 + $0x28] sm:$0xf0] }
  0x22   :  { %v696_v17 = vor.u32 %v793_v16, %v695_v14  ;;  %v683_v20 = vld [vmem:[%s1198_s2 + $0xe0] sm:$0xf]  ;;  %v790_v21 = vld [vmem:[%s1198_s2 + $0xe8] sm:$0xf0]  ;;  %v588_v22 = vor.u32 %v766_v19, %v587_v18  ;;  %v575_v24 = vld [vmem:[%s1198_s2 + $0x8] sm:$0xf] }
  0x23   :  { %414 = vmatpush.bf16.msra.mxu2 %v568_v36  ;;  %v684_v23 = vor.u32 %v790_v21, %v683_v20  ;;  %v763_v25 = vld [vmem:[%s1198_s2 + $0x10] sm:$0xf0]  ;;  %v671_v26 = vld [vmem:[%s1198_s2 + $0xc8] sm:$0xf]  ;;  %v19_v30 = vld [vmem:[%s1199_s3] sm:$0x3] }
  0x24   :  { %427 = vmatpush.bf16.msra.mxu3 %v664_v37  ;;  %v787_v27 = vld [vmem:[%s1198_s2 + $0xd0] sm:$0xf0]  ;;  %v576_v28 = vor.u32 %v763_v25, %v575_v24  ;;  %v29_v31 = vperm.slane %v19_v30, 0  ;;  %v30_v32 = vperm.slane %v19_v30, 1  ;;  %v20_v43 = vld [vmem:[%s1199_s3 + $0x2] sm:$0x3] }
  0x25   :  { %439 = vmatpush.bf16.msrb.mxu0 %v584_v49  ;;  %452 = vmatpush.bf16.msrb.mxu1 %v680_v53  ;;  %v672_v29 = vor.u32 %v787_v27, %v671_v26  ;;  %v486_v51 = vperm.slane %v20_v43, 0  ;;  %v812_v6 = vld [vmem:[%s1199_s3 + $0x4] ss:$0 sm:$0xff] }
  0x27   :  { %459 = vmatpush.bf16.msrb.mxu2 %v660_v38 }
  0x28   :  { %472 = vmatpush.bf16.msrb.mxu3 %v756_v39 }
  0x29   :  { %440 = vmatpush.bf16.msrb.mxu0 %v572_v61  ;;  %453 = vmatpush.bf16.msrb.mxu1 %v668_v1 }
  0x2b   :  { %460 = vmatpush.bf16.msrb.mxu2 %v648_v44 }
  0x2c   :  { %473 = vmatpush.bf16.msrb.mxu3 %v744_v45 }
  0x2d   :  { %509 = vmatpush.bf16.msra.mxu1 %v756_v39  ;;  %496 = vmatpush.bf16.msra.mxu0 %v660_v38 }
  0x2f   :  { %461 = vmatpush.bf16.msrb.mxu2 %v636_v54 }
  0x30   :  { %474 = vmatpush.bf16.msrb.mxu3 %v732_v57 }
  0x31   :  { %510 = vmatpush.bf16.msra.mxu1 %v744_v45  ;;  %497 = vmatpush.bf16.msra.mxu0 %v648_v44  ;;  %v487_v45 = vperm.slane %v20_v43, 1 }
  0x33   :  { %462 = vmatpush.bf16.msrb.mxu2 %v624_v2 }
  0x34   :  { %475 = vmatpush.bf16.msrb.mxu3 %v720_v5 }
  0x35   :  { %511 = vmatpush.bf16.msra.mxu1 %v732_v57  ;;  %498 = vmatpush.bf16.msra.mxu0 %v636_v54 }
  0x37   :  { %463 = vmatpush.bf16.msrb.mxu2 %v612_v9 }
  0x38   :  { %476 = vmatpush.bf16.msrb.mxu3 %v708_v11 }
  0x39   :  { %512 = vmatpush.bf16.msra.mxu1 %v720_v5  ;;  %499 = vmatpush.bf16.msra.mxu0 %v624_v2 }
  0x3b   :  { %464 = vmatpush.bf16.msrb.mxu2 %v600_v15 }
  0x3c   :  { %477 = vmatpush.bf16.msrb.mxu3 %v696_v17 }
  0x3d   :  { %513 = vmatpush.bf16.msra.mxu1 %v708_v11  ;;  %500 = vmatpush.bf16.msra.mxu0 %v612_v9 }
  0x3f   :  { %465 = vmatpush.bf16.msrb.mxu2 %v588_v22 }
  0x40   :  { %478 = vmatpush.bf16.msrb.mxu3 %v684_v23 }
  0x41   :  { %514 = vmatpush.bf16.msra.mxu1 %v696_v17  ;;  %501 = vmatpush.bf16.msra.mxu0 %v600_v15 }
  0x43   :  { %466 = vmatpush.bf16.msrb.mxu2 %v576_v28 }
  0x44   :  { %479 = vmatpush.bf16.msrb.mxu3 %v672_v29 }
  0x45   :  { %515 = vmatpush.bf16.msra.mxu1 %v684_v23  ;;  %502 = vmatpush.bf16.msra.mxu0 %v588_v22 }
  0x49   :  { %516 = vmatpush.bf16.msra.mxu1 %v672_v29  ;;  %503 = vmatpush.bf16.msra.mxu0 %v576_v28 }
  0x88   :  { %v66_v33 = vpop.f32.mrf.mxu0 }
  0x89   :  { %v67_v34 = vadd.f32 %v66_v33, %v29_v31  ;;  %v79_v35 = vpop.f32.mrf.mxu1 }
  0x8a   :  { %v80_v36 = vadd.f32 %v79_v35, %v30_v32 }
  0x8b   :  { %v83_v37 = vmax.f32 %v67_v34, 0.0 }
  0x8c   :  { %v84_v38 = vmax.f32 %v80_v36, 0.0 }
  0x8d   :  { %v85_v39 = vpack.c.bf16 %v83_v37, %v83_v37 }
  0x8e   :  { %v86_v40 = vpack.c.bf16 %v84_v38, %v84_v38 }
  0x8f   :  { %415 = vmatmul.bf16.vlgmr.msra.gmra.mxu2 %v85_v39  ;;  %441 = vmatmul.bf16.vlgmr.msrb.gmra.mxu0 %v85_v39 }
  0x90   :  { %428 = vmatmul.bf16.vlgmr.msra.gmra.mxu3 %v86_v40  ;;  %454 = vmatmul.bf16.vlgmr.msrb.gmra.mxu1 %v86_v40  ;;  %v68_v41 = vpop.f32.mrf.mxu0 }
  0x91   :  { %v81_v42 = vpop.f32.mrf.mxu1 }
  0x9f   :  { %467 = vmatmul.bf16.vlgmr.msrb.gmra.mxu2 %v85_v39 }
  0xa0   :  { %480 = vmatmul.bf16.vlgmr.msrb.gmra.mxu3 %v86_v40 }
 0x10c   :  { %v442_v44 = vpop.f32.mrf.mxu0 }
 0x10d   :  { %v455_v46 = vpop.f32.mrf.mxu1 }
 0x10e   :  { %v456_v47 = vadd.f32 %v455_v46, %v442_v44 }
 0x110   :  { %v491_v48 = vadd.f32 %v487_v45, %v456_v47 }
 0x112   :  { %v493_v49 = vmax.f32 %v491_v48, 0.0  ;;  %v416_v50 = vpop.f32.mrf.mxu2 }
 0x113   :  { %v429_v52 = vpop.f32.mrf.mxu3 }
 0x114   :  { %v495_v53 = vpack.c.bf16 %v493_v49, %v493_v49  ;;  %v430_v54 = vadd.f32 %v429_v52, %v416_v50  ;;  %v444_v55 = vpop.f32.mrf.mxu0 }
 0x115   :  { %v457_v56 = vpop.f32.mrf.mxu1 }
 0x116   :  { %v490_v57 = vadd.f32 %v486_v51, %v430_v54  ;;  %517 = vmatmul.bf16.vlgmr.msra.gmra.mxu1 %v495_v53 }
 0x118   :  { %v492_v58 = vmax.f32 %v490_v57, 0.0 }
 0x11a   :  { %v494_v59 = vpack.c.bf16 %v492_v58, %v492_v58  ;;  %v418_v60 = vpop.f32.mrf.mxu2 }
 0x11b   :  { %v431_v61 = vpop.f32.mrf.mxu3 }
 0x11c   :  { %504 = vmatmul.bf16.vlgmr.msra.gmra.mxu0 %v494_v59 }
 0x122   :  { %v468_v62 = vpop.f32.mrf.mxu2 }
 0x123   :  { %v481_v63 = vpop.f32.mrf.mxu3 }
 0x124   :  { %v482_v0 = vadd.f32 %v481_v63, %v468_v62 }
 0x12a   :  { %v470_v1 = vpop.f32.mrf.mxu2 }
 0x12b   :  { %v483_v2 = vpop.f32.mrf.mxu3 }
 0x193   :  { %v518_v3 = vpop.f32.mrf.mxu1 }
 0x199   :  { %v505_v4 = vpop.f32.mrf.mxu0 }
 0x19a   :  { %v519_v5 = vadd.f32 %v518_v3, %v505_v4 }
 0x19b   :  { %v520_v7 = vpop.f32.mrf.mxu1 }
 0x19c   :  { %v522_v8 = vadd.f32 %v519_v5, %v482_v0 }
 0x19e   :  { %v526_v9 = vadd.f32 %v812_v6, %v522_v8 }
 0x1a0   :  { %528 = vst.msk [vmem:[#allocation2] sm:$0xff] %vm527_vm1, %v526_v9 }
 0x1a1   :  { %v507_v10 = vpop.f32.mrf.mxu0 }
 0x1a2   :  { %532 = vsyncadd [#allocation3], 96  ;;  %s535_s10 = sshll.u32 %s1200_s4, 4  ;;  %s839_s11 = smov [#allocation2]   ;;  %s536_s10 = int_to_ptr.hbm [resolvable:$true] %s535_s10 }
 0x1a3   :  { %s533_s12 = sshll.u32 %s839_s11, 4  ;;  %s840_s1 = smov 32   ;;  %s534_s12 = int_to_ptr.vmem [resolvable:$true] %s533_s12 }
 0x1a4   :  { %s841_s13 = smov 2  }
 0x1a5   :  { %541 = dma.vmem_to_hbm [thread:$0]  %s534_s12, 32, %s536_s10, [#allocation3], %s840_s1, %s840_s1, %s841_s13  }
 0x1a6   :  { %837 = dma.done.wait [#allocation3], 128  }
 0x1a7   :  { %838 = vsyncadd [#allocation3], 4294967168 }
 0x1a8   :  { %546 = vsyncpa [#allocation3], 1 }

</bundles_post_ra>
